<compile_context>
chip_gen: v5e
topology: v5e:2x2
jax: 0.10.0
libtpu: 0.0.40
codegen_flags: <defaults>
</compile_context>

<pallas_src>
import jax
import jax.numpy as jnp
from jax.experimental import pallas as pl
from jax.experimental.pallas import tpu as pltpu


def _round_up(x, m):
    return (x + m - 1) // m * m


def _pick_m_tile(mp):
    for t in (256, 128, 64, 32, 16):
        if mp % t == 0:
            return t
    return 16


def _pick_n_tile(np_):
    for t in (256, 128):
        if np_ % t == 0:
            return t
    return 128


def _pick_k_tile(kp):
    for t in (512, 384, 256):
        if kp % t == 0:
            return t
    if kp <= 1024:
        return kp
    return 128


# ----------------------------- tiled MXU matmul -----------------------------

def _matmul_kernel(a_ref, b_ref, o_ref, acc_ref):
    @pl.when(pl.program_id(2) == 0)
    def _():
        acc_ref[...] = jnp.zeros_like(acc_ref)
    acc_ref[...] += jnp.dot(a_ref[...], b_ref[...],
                            preferred_element_type=jnp.float32)

    @pl.when(pl.program_id(2) == pl.num_programs(2) - 1)
    def _():
        o_ref[...] = acc_ref[...].astype(o_ref.dtype)


def _matmul_bias_kernel(a_ref, b_ref, bias_ref, o_ref, acc_ref):
    @pl.when(pl.program_id(2) == 0)
    def _():
        acc_ref[...] = jnp.zeros_like(acc_ref)
    acc_ref[...] += jnp.dot(a_ref[...], b_ref[...],
                            preferred_element_type=jnp.float32)

    @pl.when(pl.program_id(2) == pl.num_programs(2) - 1)
    def _():
        o_ref[...] = (acc_ref[...] + bias_ref[...]).astype(o_ref.dtype)


def matmul_pallas(a, b, bias=None):
    """a: (M, K), b: (K, N), optional bias (N,) f32 -> (M, N) f32.
    Inputs are cast to bf16; accumulation is f32 in a VMEM scratch."""
    M, K = a.shape
    K2, N = b.shape
    assert K == K2
    a = a.astype(jnp.bfloat16)
    b = b.astype(jnp.bfloat16)

    Mp, Kp, Np = _round_up(M, 16), _round_up(K, 128), _round_up(N, 128)
    TM, TK, TN = _pick_m_tile(Mp), _pick_k_tile(Kp), _pick_n_tile(Np)

    ap = jnp.pad(a, ((0, Mp - M), (0, Kp - K)))
    bp = jnp.pad(b, ((0, Kp - K), (0, Np - N)))
    grid = (Mp // TM, Np // TN, Kp // TK)

    in_specs = [pl.BlockSpec((TM, TK), lambda i, j, k: (i, k)),
                pl.BlockSpec((TK, TN), lambda i, j, k: (k, j))]
    args = [ap, bp]
    if bias is None:
        kernel = _matmul_kernel
    else:
        biasp = jnp.pad(bias.reshape(1, -1).astype(jnp.float32),
                        ((0, 0), (0, Np - N)))
        in_specs.append(pl.BlockSpec((1, TN), lambda i, j, k: (0, j)))
        args.append(biasp)
        kernel = _matmul_bias_kernel

    out = pl.pallas_call(
        kernel,
        out_shape=jax.ShapeDtypeStruct((Mp, Np), jnp.float32),
        grid_spec=pltpu.PrefetchScalarGridSpec(
            num_scalar_prefetch=0, grid=grid,
            in_specs=in_specs,
            out_specs=pl.BlockSpec((TM, TN), lambda i, j, k: (i, j)),
            scratch_shapes=[pltpu.VMEM((TM, TN), jnp.float32)]),
        compiler_params=pltpu.CompilerParams(
            dimension_semantics=("parallel", "parallel", "arbitrary")),
    )(*args)
    return out[:M, :N]


# ----------------------- BatchNorm (two-phase, gridded) -----------------------

def _bn_stats_kernel(x_ref, sum_ref, sq_ref):
    @pl.when(pl.program_id(0) == 0)
    def _():
        sum_ref[...] = jnp.zeros_like(sum_ref)
        sq_ref[...] = jnp.zeros_like(sq_ref)
    x = x_ref[...]
    sum_ref[...] += jnp.sum(x, axis=0, keepdims=True)
    sq_ref[...] += jnp.sum(x * x, axis=0, keepdims=True)


def _make_bn_apply_kernel(apply_relu, has_residual):
    if has_residual:
        def kernel(x_ref, res_ref, scale_ref, shift_ref, o_ref):
            y = x_ref[...] * scale_ref[...] + shift_ref[...] + res_ref[...]
            if apply_relu:
                y = jnp.maximum(y, 0.0)
            o_ref[...] = y
    else:
        def kernel(x_ref, scale_ref, shift_ref, o_ref):
            y = x_ref[...] * scale_ref[...] + shift_ref[...]
            if apply_relu:
                y = jnp.maximum(y, 0.0)
            o_ref[...] = y
    return kernel


def batchnorm_act(x, gamma, beta, *, relu, residual=None, eps=1e-5):
    """x: (R, C) f32, R = N*H*W. Training-mode batch statistics (matches
    nn.BatchNorm2d default since the PyTorch module never calls .eval()),
    fused optional residual add and ReLU."""
    R, C = x.shape
    TR = min(512, _round_up(R, 8))
    Rp = _round_up(R, TR)
    xp = jnp.pad(x, ((0, Rp - R), (0, 0)))
    grid = (Rp // TR,)

    # phase 1: one-pass sum / sum-of-squares reduction (resident accumulators)
    s, sq = pl.pallas_call(
        _bn_stats_kernel,
        out_shape=(jax.ShapeDtypeStruct((1, C), jnp.float32),
                   jax.ShapeDtypeStruct((1, C), jnp.float32)),
        grid_spec=pltpu.PrefetchScalarGridSpec(
            num_scalar_prefetch=0, grid=grid,
            in_specs=[pl.BlockSpec((TR, C), lambda i: (i, 0))],
            out_specs=[pl.BlockSpec((1, C), lambda i: (0, 0)),
                       pl.BlockSpec((1, C), lambda i: (0, 0))]),
        compiler_params=pltpu.CompilerParams(
            dimension_semantics=("arbitrary",)),
    )(xp)

    # tiny finalize (C-sized, glue)
    mean = s / R
    var = jnp.maximum(sq / R - mean * mean, 0.0)
    scale = gamma.reshape(1, C) * jax.lax.rsqrt(var + eps)
    shift = beta.reshape(1, C) - mean * scale

    # phase 2: gridded fused apply (+residual)(+relu)
    args = [xp]
    in_specs = [pl.BlockSpec((TR, C), lambda i: (i, 0))]
    if residual is not None:
        args.append(jnp.pad(residual, ((0, Rp - R), (0, 0))))
        in_specs.append(pl.BlockSpec((TR, C), lambda i: (i, 0)))
    args += [scale, shift]
    in_specs += [pl.BlockSpec((1, C), lambda i: (0, 0)),
                 pl.BlockSpec((1, C), lambda i: (0, 0))]

    out = pl.pallas_call(
        _make_bn_apply_kernel(relu, residual is not None),
        out_shape=jax.ShapeDtypeStruct((Rp, C), jnp.float32),
        grid_spec=pltpu.PrefetchScalarGridSpec(
            num_scalar_prefetch=0, grid=grid,
            in_specs=in_specs,
            out_specs=pl.BlockSpec((TR, C), lambda i: (i, 0))),
        compiler_params=pltpu.CompilerParams(
            dimension_semantics=("parallel",)),
    )(*args)
    return out[:R]


# ------------------------------- max pool -------------------------------

def _make_maxpool_kernel(nwin):
    def kernel(*refs):
        o_ref = refs[nwin]
        acc = refs[0][...]
        for i in range(1, nwin):
            acc = jnp.maximum(acc, refs[i][...])
        o_ref[...] = acc
    return kernel


def maxpool2d_pallas(x, kernel=3, stride=2, pad=1):
    """x: (N, H, W, C) f32; PyTorch-equivalent max pool (implicit -inf pad)."""
    N, H, W, C = x.shape
    neg = jnp.finfo(x.dtype).min
    xp = jnp.pad(x, ((0, 0), (pad, pad), (pad, pad), (0, 0)),
                 constant_values=neg)
    OH = (H + 2 * pad - kernel) // stride + 1
    OW = (W + 2 * pad - kernel) // stride + 1
    R = N * OH * OW
    TR = min(512, _round_up(R, 8))
    Rp = _round_up(R, TR)

    taps = []
    for i in range(kernel):
        for j in range(kernel):
            t = xp[:, i:i + stride * OH:stride,
                   j:j + stride * OW:stride, :].reshape(R, C)
            taps.append(jnp.pad(t, ((0, Rp - R), (0, 0))))

    spec = pl.BlockSpec((TR, C), lambda i: (i, 0))
    out = pl.pallas_call(
        _make_maxpool_kernel(kernel * kernel),
        out_shape=jax.ShapeDtypeStruct((Rp, C), jnp.float32),
        grid_spec=pltpu.PrefetchScalarGridSpec(
            num_scalar_prefetch=0, grid=(Rp // TR,),
            in_specs=[spec] * (kernel * kernel),
            out_specs=spec),
        compiler_params=pltpu.CompilerParams(
            dimension_semantics=("parallel",)),
    )(*taps)
    return out[:R].reshape(N, OH, OW, C)


# ----------------------------- conv via im2col -----------------------------

def _im2col(x, kh, kw, stride, pad):
    x = x.astype(jnp.bfloat16)          # build the slab directly in bf16
    N, H, W, C = x.shape
    if pad:
        x = jnp.pad(x, ((0, 0), (pad, pad), (pad, pad), (0, 0)))
    OH = (H + 2 * pad - kh) // stride + 1
    OW = (W + 2 * pad - kw) // stride + 1
    cols = []
    for i in range(kh):
        for j in range(kw):
            cols.append(x[:, i:i + stride * OH:stride,
                          j:j + stride * OW:stride, :])
    col = jnp.stack(cols, axis=-1)      # (N, OH, OW, C, kh*kw)
    return col.reshape(N * OH * OW, C * kh * kw), OH, OW


def conv2d_pallas(x, conv):
    """x: (N,H,W,Cin) f32; conv['w'] is pre-reshaped (Cin*kh*kw, Cout) bf16."""
    col, OH, OW = _im2col(x, conv['kh'], conv['kw'], conv['stride'], conv['pad'])
    y = matmul_pallas(col, conv['w'])   # (N*OH*OW, Cout) f32
    return y, OH, OW


# ----------------------------- resnet18 params -----------------------------

def _kaiming_normal(key, shape, fan_in):
    return jax.random.normal(key, shape, dtype=jnp.float32) * jnp.sqrt(2.0 / fan_in)


def _make_conv(key, cout, cin, kh, kw, stride, pad):
    w = _kaiming_normal(key, (cout, cin, kh, kw), cin * kh * kw)
    # pre-transform once: (Cout, Cin, kh, kw) -> (Cin*kh*kw, Cout), bf16
    return {'w': w.reshape(cout, cin * kh * kw).T.astype(jnp.bfloat16),
            'kh': kh, 'kw': kw, 'stride': stride, 'pad': pad, 'cout': cout}


def make_resnet_multi_params(key, class_nums=(1000, 1000, 1000)):
    keys = iter(jax.random.split(key, 64))
    p = {}
    p['conv1'] = _make_conv(next(keys), 64, 3, 7, 7, 2, 3)
    p['bn1_g'] = jnp.ones((64,), jnp.float32)
    p['bn1_b'] = jnp.zeros((64,), jnp.float32)

    layer_specs = [(64, 64, 1), (64, 128, 2), (128, 256, 2), (256, 512, 2)]
    layers = []
    for cin, cout, stride in layer_specs:
        blocks = []
        for b in range(2):  # resnet18: 2 BasicBlocks per stage
            bc_in = cin if b == 0 else cout
            bs = stride if b == 0 else 1
            blk = {
                'conv1': _make_conv(next(keys), cout, bc_in, 3, 3, bs, 1),
                'bn1_g': jnp.ones((cout,), jnp.float32),
                'bn1_b': jnp.zeros((cout,), jnp.float32),
                'conv2': _make_conv(next(keys), cout, cout, 3, 3, 1, 1),
                'bn2_g': jnp.ones((cout,), jnp.float32),
                'bn2_b': jnp.zeros((cout,), jnp.float32),
            }
            if bs != 1 or bc_in != cout:
                blk['down'] = _make_conv(next(keys), cout, bc_in, 1, 1, bs, 0)
                blk['down_g'] = jnp.ones((cout,), jnp.float32)
                blk['down_b'] = jnp.zeros((cout,), jnp.float32)
            blocks.append(blk)
        layers.append(blocks)
    p['layers'] = layers

    # fc heads (kaiming_normal_, zero bias) fused into one matmul: concat on N
    fws, fbs = [], []
    for cn in class_nums:
        fw = _kaiming_normal(next(keys), (cn, 512), 512)
        fws.append(fw.T)
        fbs.append(jnp.zeros((cn,), jnp.float32))
    p['fc_w'] = jnp.concatenate(fws, axis=1).astype(jnp.bfloat16)  # (512, sumN)
    p['fc_b'] = jnp.concatenate(fbs, axis=0)                       # (sumN,)
    p['class_nums'] = tuple(class_nums)
    return p


# ----------------------------- forward pass -----------------------------

def _basic_block_forward(x, blk):
    # x: (N, H, W, Cin)
    N = x.shape[0]
    cout = blk['conv1']['cout']
    identity = x.reshape(-1, x.shape[-1])
    y, OH, OW = conv2d_pallas(x, blk['conv1'])
    y = batchnorm_act(y, blk['bn1_g'], blk['bn1_b'], relu=True)
    y2, OH2, OW2 = conv2d_pallas(y.reshape(N, OH, OW, cout), blk['conv2'])
    if 'down' in blk:
        d, _, _ = conv2d_pallas(x, blk['down'])
        identity = batchnorm_act(d, blk['down_g'], blk['down_b'], relu=False)
    out = batchnorm_act(y2, blk['bn2_g'], blk['bn2_b'], relu=True,
                        residual=identity)
    return out.reshape(N, OH2, OW2, cout)


def resnet_multi_forward(params, x_nchw):
    """Equivalent of resnet_multi('resnet18').forward(x): returns (x1, x2, x3)."""
    x = jnp.transpose(x_nchw.astype(jnp.float32), (0, 2, 3, 1))  # NCHW -> NHWC
    N = x.shape[0]
    # stem: conv1 / bn1 / relu / maxpool
    y, OH, OW = conv2d_pallas(x, params['conv1'])
    y = batchnorm_act(y, params['bn1_g'], params['bn1_b'], relu=True)
    x = maxpool2d_pallas(y.reshape(N, OH, OW, 64), 3, 2, 1)
    # layer1..layer4
    for blocks in params['layers']:
        for blk in blocks:
            x = _basic_block_forward(x, blk)
    # adaptive avg pool (1,1) + flatten  (pure glue: mean over spatial dims)
    feat = jnp.mean(x, axis=(1, 2))  # (N, 512) f32
    # fused fc heads: one matmul+bias, then split
    logits = matmul_pallas(feat, params['fc_w'], params['fc_b'])
    outs, off = [], 0
    for cn in params['class_nums']:
        outs.append(logits[:, off:off + cn])
        off += cn
    return tuple(outs)


if __name__ == "__main__":
    key = jax.random.PRNGKey(0)
    pkey, xkey = jax.random.split(key)
    class_nums = (10, 7, 5)  # class_num1/2/3 constructor args (small for demo)
    params = make_resnet_multi_params(pkey, class_nums)
    # small NCHW input, 3 channels as required by resnet18 conv1
    x = jax.random.normal(xkey, (2, 3, 32, 32), dtype=jnp.float32)
    x1, x2, x3 = resnet_multi_forward(params, x)
    jax.block_until_ready((x1, x2, x3))
    assert x1.shape == (2, 10) and x2.shape == (2, 7) and x3.shape == (2, 5)
    assert all(bool(jnp.all(jnp.isfinite(o))) for o in (x1, x2, x3))
    print("KERNEL_OK")
</pallas_src>

<mosaic_0001>
module attributes {stable_mosaic.version = 11 : i64} {
  func.func @_matmul_kernel(%arg0: i32, %arg1: i32, %arg2: i32, %arg3: memref<256x256xbf16, #tpu.memory_space<vmem>>, %arg4: memref<256x128xbf16, #tpu.memory_space<vmem>>, %arg5: memref<256x128xf32, #tpu.memory_space<vmem>>, %arg6: memref<256x128xf32, #tpu.memory_space<vmem>>) attributes {dimension_semantics = [#tpu.dimension_semantics<parallel>, #tpu.dimension_semantics<parallel>, #tpu.dimension_semantics<arbitrary>], iteration_bounds = array<i64: 2, 1, 1>, scalar_prefetch = 0 : i64, scratch_operands = 1 : i64, tpu.core_type = #tpu.core_type<tc>, window_params = [{transform_indices = @transform_0, window_bounds = array<i64: 256, 256>}, {transform_indices = @transform_1, window_bounds = array<i64: 256, 128>}, {transform_indices = @transform_2, window_bounds = array<i64: 256, 128>}]} {
    %c0_i32 = arith.constant 0 : i32
    %0 = arith.cmpi eq, %arg2, %c0_i32 : i32
    %1 = arith.extui %0 : i1 to i32
    %c0_i32_0 = arith.constant 0 : i32
    %2 = arith.cmpi ne, %1, %c0_i32_0 : i32
    scf.if %2 {
      %cst_10 = arith.constant 0.000000e+00 : f32
      %12 = vector.broadcast %cst_10 : f32 to vector<256x128xf32>
      %c0_11 = arith.constant 0 : index
      %c0_12 = arith.constant 0 : index
      %13 = vector.load %arg6[%c0_11, %c0_12] : memref<256x128xf32, #tpu.memory_space<vmem>>, vector<256x128xf32>
      tpu.vector_store %arg6[%c0_11, %c0_12], %12 {strides = array<i32>} : memref<256x128xf32, #tpu.memory_space<vmem>>, vector<256x128xf32>,
    } else {
    }
    %c0 = arith.constant 0 : index
    %c0_1 = arith.constant 0 : index
    %3 = vector.load %arg6[%c0, %c0_1] : memref<256x128xf32, #tpu.memory_space<vmem>>, vector<256x128xf32>
    %c0_2 = arith.constant 0 : index
    %c0_3 = arith.constant 0 : index
    %4 = vector.load %arg3[%c0_2, %c0_3] : memref<256x256xbf16, #tpu.memory_space<vmem>>, vector<256x256xbf16>
    %c0_4 = arith.constant 0 : index
    %c0_5 = arith.constant 0 : index
    %5 = vector.load %arg4[%c0_4, %c0_5] : memref<256x128xbf16, #tpu.memory_space<vmem>>, vector<256x128xbf16>
    %cst = arith.constant dense<0.000000e+00> : vector<256x128xf32>
    %6 = tpu.matmul %4, %5, %cst {dimension_numbers = #tpu.dot_dimension_numbers<[1], [0], [0], [1], [0, 0, 1, 1], [], []>} : vector<256x256xbf16>, vector<256x128xbf16>, vector<256x128xf32> -> vector<256x128xf32>
    %7 = arith.addf %3, %6 : vector<256x128xf32>
    %c0_6 = arith.constant 0 : index
    %c0_7 = arith.constant 0 : index
    %8 = vector.load %arg6[%c0_6, %c0_7] : memref<256x128xf32, #tpu.memory_space<vmem>>, vector<256x128xf32>
    tpu.vector_store %arg6[%c0_6, %c0_7], %7 {strides = array<i32>} : memref<256x128xf32, #tpu.memory_space<vmem>>, vector<256x128xf32>,
    %c0_i32_8 = arith.constant 0 : i32
    %9 = arith.cmpi eq, %arg2, %c0_i32_8 : i32
    %10 = arith.extui %9 : i1 to i32
    %c0_i32_9 = arith.constant 0 : i32
    %11 = arith.cmpi ne, %10, %c0_i32_9 : i32
    scf.if %11 {
      %c0_10 = arith.constant 0 : index
      %c0_11 = arith.constant 0 : index
      %12 = vector.load %arg6[%c0_10, %c0_11] : memref<256x128xf32, #tpu.memory_space<vmem>>, vector<256x128xf32>
      %c0_12 = arith.constant 0 : index
      %c0_13 = arith.constant 0 : index
      %13 = vector.load %arg5[%c0_12, %c0_13] : memref<256x128xf32, #tpu.memory_space<vmem>>, vector<256x128xf32>
      tpu.vector_store %arg5[%c0_12, %c0_13], %12 {strides = array<i32>} : memref<256x128xf32, #tpu.memory_space<vmem>>, vector<256x128xf32>,
    } else {
    }
    return
  }
  func.func @transform_0(%arg0: i32, %arg1: i32, %arg2: i32) -> (i32, i32) {
    %c0_i32 = arith.constant 0 : i32
    return %arg0, %arg2 : i32, i32
  }
  func.func @transform_1(%arg0: i32, %arg1: i32, %arg2: i32) -> (i32, i32) {
    %c0_i32 = arith.constant 0 : i32
    return %arg2, %arg1 : i32, i32
  }
  func.func @transform_2(%arg0: i32, %arg1: i32, %arg2: i32) -> (i32, i32) {
    %c0_i32 = arith.constant 0 : i32
    return %arg0, %arg1 : i32, i32
  }
}

</mosaic_0001>

<bundles_post_ra>
// kernel: tpu_custom_call.1
= control target key start
LH: loop header
LB: loop body
LE: loop exit
PB: predicated region body
PF: predicated region fallthrough
CT: control target
= control target key end

     0   :  { %7 = vsyncpa [#allocation4], 0  ;;  %s1819_s0 = inlined_call_operand.hbm [shape: bf16[512,256], index: 0, kind: input, shape index: {}]   ;;  %s1820_s1 = inlined_call_operand.hbm [shape: bf16[256,128], index: 1, kind: input, shape index: {}]   ;;  %s1821_s2 = inlined_call_operand.hbm [shape: f32[512,128], index: 2, kind: output, shape index: {}]  }
   0x1   :  { %9 = vsyncpa [#allocation4 + $0x1], 0 }
   0x2   :  { %10 = vsyncpa [#allocation7], 0 }
   0x3   :  { %11 = vsyncpa [#allocation5], 0 }
   0x4   :  { %13 = vsyncpa [#allocation5 + $0x1], 0  ;;  %s1565_s9 = smov 0   ;;  %s1567_s10 = smov 0  }
   0x5   :  { %s1569_s11 = smov 0   ;;  %s1571_s12 = smov 0  }
   0x6   :  { %s1573_s13 = smov 0   ;;  %s1575_s14 = smov 0  }
   0x7 LB: > { %s1039_s15 = sadd.s32 4294967295, %s1541_s14   ;;  %s1040_s16 = sadd.s32 4294967294, %s1541_s14   ;;  %s1541_s14 = sphi %s1575_s14, %s19_s14   ;;  %s1537_s13 = sphi %s1573_s13, %s1833_s13   ;;  %s1533_s12 = sphi %s1571_s12, %s1832_s12   ;;  %s1529_s11 = sphi %s1569_s11, %s1831_s11   ;;  %s1525_s10 = sphi %s1567_s10, %s1830_s10   ;;  %s1521_s9 = sphi %s1565_s9, %s1829_s9  }
   0x8   : > { %p60_p0 = scmp.ne.s32.totalorder %s1525_s10, %s1521_s9  ;;  %p1599_p1 = scmp.eq.s32.totalorder %s1039_s15, 0 }
   0x9   : > { %p1603_p2 = scmp.eq.s32.totalorder %s1039_s15, 1  ;;  %p120_p3 = scmp.eq.s32.totalorder %s1040_s16, 1 }
   0xa   : > { %p1609_p4 = por %p1599_p1, %p60_p0  ;;  %p1041_p5 = scmp.ge.s32.totalorder %s1541_s14, 1 }
   0xb   : > { %p1614_p6 = por %p120_p3, %p60_p0  ;;  %p127_p7 = scmp.lt.s32.totalorder %s1541_s14, 3 }
   0xc   : > { %s142_s23 = sshll.u32 %s1820_s1, 4  ;;  %s1543_s25 = smov [#allocation6]   ;;  %s143_s23 = int_to_ptr.hbm [resolvable:$true] %s142_s23 }
   0xd   : > { %p1622_p8 = pnand %p1041_p5, %p127_p7  ;;  %s144_s26 = sshll.u32 %s1543_s25, 4  ;;  %s145_s26 = int_to_ptr.vmem [resolvable:$true] %s144_s26 }
   0xe   : > { %p1043_p11 = scmp.ge.s32.totalorder %s1541_s14, 2  ;;  %s1544_s27 = smov 64  }
   0xf   : > { %p1324_p9 = pneg %p1622_p8  ;;  %s1545_s28 = smov 4  }
  0x10   : > { %s38_s29 = sadd.s32 1, %s1537_s13  ;;  %s47_s30 = sadd.s32 1, %s1529_s11 }
  0x11   : > { %p1325_p10 = pnand %p1324_p9, %p1599_p1  ;;  %p40_p12 = scmp.ge.s32.totalorder %s38_s29, 2 }
  0x12   : > { %p54_p13 = scmp.ne.s32.totalorder %s1529_s11, %s1525_s10  ;;  %p55_p0 = scmp.eq.s32.totalorder %s1541_s14, 0 }
  0x13   : > { %1327 = dma.hbm_to_vmem [thread:$0]  (!%p1325_p10), %s143_s23, 2048, %s145_s26, [#allocation7], %s1544_s27, %s1544_s27, %s1545_s28  }
  0x14   : > { %s1835_s29 = smov (%p40_p12, %s38_s29), 0  ;;  %p1638_p3 = por %p55_p0, %p54_p13 }
  0x15   : > { %p1644_p5 = por %p1603_p2, %p54_p13  ;;  %s42_s5 = ssub.s32 %s1537_s13, %s1835_s29 }
  0x16   : > { %p1337_p7 = scmp.lt.s32.totalorder %s1541_s14, 2  ;;  %p45_p9 = scmp.eq.s32.totalorder %s42_s5, 0 }
  0x17   : > { %s158_s6 = sand.u32 1, %s1529_s11   ;;  %s1250_s15 = sshll.u32 %s1537_s13, 8 }
  0x18   : > { %s1044_s7 = sshll.u32 %s158_s6, 8  ;;  %s170_s22 = scalar_lea.hbm %s1819_s0, %s1250_s15 }
  0x19   : > { %s1653_s8 = scalar_select %p45_p9, %s1529_s11, %s47_s30  }
  0x1a   : > { %s162_s23 = scalar_lea.vmem [#allocation3], %s1044_s7  ;;  %s171_s18 = sshll.u32 %s170_s22, 4  ;;  %s172_s18 = int_to_ptr.hbm [resolvable:$true] %s171_s18 }
  0x1b   : > { %s173_s25 = sshll.u32 %s162_s23, 4  ;;  %p1329_p2 = pnand %p1337_p7, %p1638_p3  ;;  %s174_s25 = int_to_ptr.vmem [resolvable:$true] %s173_s25 }
  0x1c   : > { %s159_s26 = scalar_lea.sflag [#allocation4], %s158_s6  ;;  %s1546_s27 = smov 128  }
  0x1d   : > { %s1547_s28 = smov 8   ;;  %185 = sbr.rel (%p1622_p8) target bundleno = 328 (0x148), region = 28 }
  0x1e   : > { %1331 = dma.hbm_to_vmem [thread:$0]  (!%p1329_p2), %s172_s18, 4096, %s174_s25, %s159_s26, %s1546_s27, %s1546_s27, %s1547_s28  }
  0x1f   : > { %s1664_s30 = sand.u32 (!%p1622_p8), 1, %s1525_s10  }
  0x20   : > { %s1049_s5 = sshll.u32 (!%p1622_p8), %s1664_s30, 8  ;;  %s188_s7 = scalar_lea.sflag (!%p1622_p8), [#allocation4], %s1664_s30 }
  0x21   : > { %s1670_s15 = scalar_lea.vmem (!%p1622_p8), [#allocation3], %s1049_s5 }
  0x22   : > { %1508 = dma.done.wait (%p1609_p4), %s188_s7, 4096  }
  0x23   : > { %1510 = vsyncadd (%p1609_p4), %s188_s7, 4294963200 }
  0x24   : > { %1512 = dma.done.wait (%p1599_p1), [#allocation7], 2048  }
  0x25   : > { %1514 = vsyncadd (%p1599_p1), [#allocation7], 4294965248  ;;  %v1290_v0 = vld [vmem:[#allocation6 + $0x38] sm:$0xff]  ;;  %v1289_v2 = vld [vmem:[#allocation6 + $0x30] sm:$0xff]  ;;  %s1746_s17 = scalar_lea.vmem [#allocation8], %s1049_s5  ;;  %s1299_s19 = sshll.u32 %s1533_s12, 8 }
  0x26   : > { %v1298_v1 = vld [vmem:[#allocation6 + $0x78] sm:$0xff]  ;;  %610 = vmatpush.bf16.msra.mxu0 %v1290_v0  ;;  %1300 = vmatpush.bf16.msra.mxu2 %v1290_v0  ;;  %v1297_v3 = vld [vmem:[#allocation6 + $0x70] sm:$0xff]  ;;  %v1288_v4 = vld [vmem:[#allocation6 + $0x28] sm:$0xff]  ;;  %s932_s6 = scalar_lea.hbm %s1821_s2, %s1299_s19  ;;  %s933_s16 = sshll.u32 %s1746_s17, 4  ;;  %s934_s16 = int_to_ptr.vmem [resolvable:$true] %s933_s16 }
  0x27   : > { %699 = vmatpush.bf16.msra.mxu1 %v1298_v1  ;;  %1308 = vmatpush.bf16.msra.mxu3 %v1298_v1  ;;  %v1296_v5 = vld [vmem:[#allocation6 + $0x68] sm:$0xff]  ;;  %v1287_v6 = vld [vmem:[#allocation6 + $0x20] sm:$0xff]  ;;  %v1286_v8 = vld [vmem:[#allocation6 + $0x18] sm:$0xff]  ;;  %s935_s21 = sshll.u32 %s932_s6, 4  ;;  %s920_s12 = scalar_lea.sflag [#allocation5], %s1664_s30  ;;  %s936_s21 = int_to_ptr.hbm [resolvable:$true] %s935_s21 }
  0x28   : > { %v1295_v7 = vld [vmem:[#allocation6 + $0x60] sm:$0xff]  ;;  %v1294_v9 = vld [vmem:[#allocation6 + $0x58] sm:$0xff]  ;;  %v1285_v10 = vld [vmem:[#allocation6 + $0x10] sm:$0xff]  ;;  %s1469_s22 = sshra.s32 %s936_s21, 4  ;;  %s1475_s26 = scalar_lea.hbm %s1821_s2, 512  ;;  %s1470_s22 = int_to_ptr.hbm [resolvable:$true] %s1469_s22 }
  0x29   : > { %v1293_v11 = vld [vmem:[#allocation6 + $0x50] sm:$0xff]  ;;  %v1284_v12 = vld [vmem:[#allocation6 + $0x8] sm:$0xff]  ;;  %v1283_v14 = vld [vmem:[#allocation6] sm:$0xff]  ;;  %s1471_s23 = scalar_lea.hbm %s1470_s22, 256  ;;  %p1476_p10 = scmp.lt.s32.totalorder %s1470_s22, %s1821_s2 }
  0x2a   : > { %611 = vmatpush.bf16.msra.mxu0 %v1289_v2  ;;  %1301 = vmatpush.bf16.msra.mxu2 %v1289_v2  ;;  %v1292_v13 = vld [vmem:[#allocation6 + $0x48] sm:$0xff]  ;;  %v1291_v15 = vld [vmem:[#allocation6 + $0x40] sm:$0xff]  ;;  %v1062_v28 = vld [vmem:[%s1670_s15 + $0x10] sm:$0xf]  ;;  %p1472_p1 = scmp.ne.s32.totalorder %s1470_s22, %s1471_s23  ;;  %p1477_p12 = scmp.lt.s32.totalorder %s1475_s26, %s1471_s23 }
  0x2b   : > { %700 = vmatpush.bf16.msra.mxu1 %v1297_v3  ;;  %1309 = vmatpush.bf16.msra.mxu3 %v1297_v3  ;;  %v1054_v16 = vld [vmem:[%s1670_s15] sm:$0xf]  ;;  %v1252_v17 = vld [vmem:[%s1670_s15 + $0x4] sm:$0xf0]  ;;  %v1251_v20 = vld [vmem:[%s1670_s15 + $0x4] sm:$0xf] }
  0x2c   : > { %v1118_v18 = vld [vmem:[%s1670_s15 + $0x80] sm:$0xf]  ;;  %v1268_v19 = vld [vmem:[%s1670_s15 + $0x84] sm:$0xf0]  ;;  %v1056_v21 = vld [vmem:[%s1670_s15 + $0x8] sm:$0xf0]  ;;  %v1055_v24 = vor.u32 %v1252_v17, %v1054_v16  ;;  %p1473_p4 = pnand %p1472_p1, %p1644_p5  ;;  %p1478_p13 = por %p1477_p12, %p1476_p10 }
  0x2d   : > { %v1267_v22 = vld [vmem:[%s1670_s15 + $0x84] sm:$0xf]  ;;  %v1120_v23 = vld [vmem:[%s1670_s15 + $0x88] sm:$0xf0]  ;;  %v1119_v25 = vor.u32 %v1268_v19, %v1118_v18  ;;  %v1059_v26 = vor.u32 %v1251_v20, %v1056_v21  ;;  %v1254_v29 = vld [vmem:[%s1670_s15 + $0x14] sm:$0xf0] }
  0x2e   : > { %612 = vmatpush.bf16.msra.mxu0 %v1288_v4  ;;  %1302 = vmatpush.bf16.msra.mxu2 %v1288_v4  ;;  %v1123_v27 = vor.u32 %v1267_v22, %v1120_v23  ;;  %v1126_v30 = vld [vmem:[%s1670_s15 + $0x90] sm:$0xf]  ;;  %v1270_v31 = vld [vmem:[%s1670_s15 + $0x94] sm:$0xf0]  ;;  %v1253_v32 = vld [vmem:[%s1670_s15 + $0x14] sm:$0xf]  ;;  %v1063_v36 = vor.u32 %v1254_v29, %v1062_v28  ;;  %p1474_p8 = pneg %p1473_p4 }
  0x2f   : > { %701 = vmatpush.bf16.msra.mxu1 %v1296_v5  ;;  %1310 = vmatpush.bf16.msra.mxu3 %v1296_v5  ;;  %v1064_v33 = vld [vmem:[%s1670_s15 + $0x18] sm:$0xf0]  ;;  %v1269_v34 = vld [vmem:[%s1670_s15 + $0x94] sm:$0xf]  ;;  %v1127_v37 = vor.u32 %v1270_v31, %v1126_v30  ;;  %v1070_v40 = vld [vmem:[%s1670_s15 + $0x20] sm:$0xf] }
  0x30   : > { %v1128_v35 = vld [vmem:[%s1670_s15 + $0x98] sm:$0xf0]  ;;  %v1067_v38 = vor.u32 %v1253_v32, %v1064_v33  ;;  %v1256_v41 = vld [vmem:[%s1670_s15 + $0x24] sm:$0xf0]  ;;  %v1134_v42 = vld [vmem:[%s1670_s15 + $0xa0] sm:$0xf]  ;;  %p1479_p0 = pnand %p1478_p13, %p1474_p8 }
  0x31   : > { %v1131_v39 = vor.u32 %v1269_v34, %v1128_v35  ;;  %v1272_v43 = vld [vmem:[%s1670_s15 + $0xa4] sm:$0xf0]  ;;  %v1255_v44 = vld [vmem:[%s1670_s15 + $0x24] sm:$0xf]  ;;  %v1072_v45 = vld [vmem:[%s1670_s15 + $0x28] sm:$0xf0]  ;;  %v1071_v48 = vor.u32 %v1256_v41, %v1070_v40 }
  0x32   : > { %613 = vmatpush.bf16.msra.mxu0 %v1287_v6  ;;  %1303 = vmatpush.bf16.msra.mxu2 %v1287_v6  ;;  %v1271_v46 = vld [vmem:[%s1670_s15 + $0xa4] sm:$0xf]  ;;  %v1136_v47 = vld [vmem:[%s1670_s15 + $0xa8] sm:$0xf0]  ;;  %v1135_v49 = vor.u32 %v1272_v43, %v1134_v42  ;;  %v1075_v50 = vor.u32 %v1255_v44, %v1072_v45  ;;  %v1078_v52 = vld [vmem:[%s1670_s15 + $0x30] sm:$0xf] }
  0x33   : > { %702 = vmatpush.bf16.msra.mxu1 %v1295_v7  ;;  %1311 = vmatpush.bf16.msra.mxu3 %v1295_v7  ;;  %v1139_v51 = vor.u32 %v1271_v46, %v1136_v47  ;;  %v1258_v53 = vld [vmem:[%s1670_s15 + $0x34] sm:$0xf0]  ;;  %v1142_v54 = vld [vmem:[%s1670_s15 + $0xb0] sm:$0xf]  ;;  %v1257_v56 = vld [vmem:[%s1670_s15 + $0x34] sm:$0xf] }
  0x34   : > { %v1274_v55 = vld [vmem:[%s1670_s15 + $0xb4] sm:$0xf0]  ;;  %v1080_v57 = vld [vmem:[%s1670_s15 + $0x38] sm:$0xf0]  ;;  %v1273_v58 = vld [vmem:[%s1670_s15 + $0xb4] sm:$0xf]  ;;  %v1079_v60 = vor.u32 %v1258_v53, %v1078_v52 }
  0x35   : > { %v1144_v59 = vld [vmem:[%s1670_s15 + $0xb8] sm:$0xf0]  ;;  %v1143_v61 = vor.u32 %v1274_v55, %v1142_v54  ;;  %v1083_v62 = vor.u32 %v1257_v56, %v1080_v57  ;;  %v1086_v0 = vld [vmem:[%s1670_s15 + $0x40] sm:$0xf]  ;;  %v1260_v1 = vld [vmem:[%s1670_s15 + $0x44] sm:$0xf0] }
  0x36   : > { %614 = vmatpush.bf16.msra.mxu0 %v1286_v8  ;;  %1304 = vmatpush.bf16.msra.mxu2 %v1286_v8  ;;  %v1147_v63 = vor.u32 %v1273_v58, %v1144_v59  ;;  %v1150_v2 = vld [vmem:[%s1670_s15 + $0xc0] sm:$0xf]  ;;  %v1276_v3 = vld [vmem:[%s1670_s15 + $0xc4] sm:$0xf0]  ;;  %v1259_v4 = vld [vmem:[%s1670_s15 + $0x44] sm:$0xf]  ;;  %v1087_v8 = vor.u32 %v1260_v1, %v1086_v0 }
  0x37   : > { %703 = vmatpush.bf16.msra.mxu1 %v1294_v9  ;;  %1312 = vmatpush.bf16.msra.mxu3 %v1294_v9  ;;  %v1088_v5 = vld [vmem:[%s1670_s15 + $0x48] sm:$0xf0]  ;;  %v1275_v6 = vld [vmem:[%s1670_s15 + $0xc4] sm:$0xf]  ;;  %v1151_v9 = vor.u32 %v1276_v3, %v1150_v2  ;;  %v1261_v16 = vld [vmem:[%s1670_s15 + $0x54] sm:$0xf] }
  0x38   : > { %v1152_v7 = vld [vmem:[%s1670_s15 + $0xc8] sm:$0xf0]  ;;  %v1096_v17 = vld [vmem:[%s1670_s15 + $0x58] sm:$0xf0]  ;;  %v1277_v18 = vld [vmem:[%s1670_s15 + $0xd4] sm:$0xf] }
  0x39   : > { %v1160_v19 = vld [vmem:[%s1670_s15 + $0xd8] sm:$0xf0]  ;;  %v1099_v22 = vor.u32 %v1261_v16, %v1096_v17  ;;  %v1263_v28 = vld [vmem:[%s1670_s15 + $0x64] sm:$0xf]  ;;  %v1104_v29 = vld [vmem:[%s1670_s15 + $0x68] sm:$0xf0] }
  0x3a   : > { %615 = vmatpush.bf16.msra.mxu0 %v1285_v10  ;;  %1305 = vmatpush.bf16.msra.mxu2 %v1285_v10  ;;  %v1091_v10 = vor.u32 %v1259_v4, %v1088_v5  ;;  %v1163_v23 = vor.u32 %v1277_v18, %v1160_v19  ;;  %v1279_v30 = vld [vmem:[%s1670_s15 + $0xe4] sm:$0xf]  ;;  %v1168_v31 = vld [vmem:[%s1670_s15 + $0xe8] sm:$0xf0]  ;;  %v1107_v34 = vor.u32 %v1263_v28, %v1104_v29  ;;  %v1265_v40 = vld [vmem:[%s1670_s15 + $0x74] sm:$0xf] }
  0x3b   : > { %704 = vmatpush.bf16.msra.mxu1 %v1293_v11  ;;  %1313 = vmatpush.bf16.msra.mxu3 %v1293_v11  ;;  %v1155_v11 = vor.u32 %v1275_v6, %v1152_v7  ;;  %v1171_v35 = vor.u32 %v1279_v30, %v1168_v31  ;;  %v1112_v41 = vld [vmem:[%s1670_s15 + $0x78] sm:$0xf0]  ;;  %v1281_v42 = vld [vmem:[%s1670_s15 + $0xf4] sm:$0xf] }
  0x3c   : > { %v1176_v43 = vld [vmem:[%s1670_s15 + $0xf8] sm:$0xf0]  ;;  %v1115_v46 = vor.u32 %v1265_v40, %v1112_v41 }
  0x3d   : > { %v1179_v47 = vor.u32 %v1281_v42, %v1176_v43 }
  0x3e   : > { %616 = vmatpush.bf16.msra.mxu0 %v1284_v12  ;;  %1306 = vmatpush.bf16.msra.mxu2 %v1284_v12  ;;  %v1094_v12 = vld [vmem:[%s1670_s15 + $0x50] sm:$0xf] }
  0x3f   : > { %705 = vmatpush.bf16.msra.mxu1 %v1292_v13  ;;  %1314 = vmatpush.bf16.msra.mxu3 %v1292_v13  ;;  %v1262_v13 = vld [vmem:[%s1670_s15 + $0x54] sm:$0xf0] }
  0x40   : > { %v1095_v20 = vor.u32 %v1262_v13, %v1094_v12 }
  0x42   : > { %617 = vmatpush.bf16.msra.mxu0 %v1283_v14  ;;  %1307 = vmatpush.bf16.msra.mxu2 %v1283_v14  ;;  %v1158_v14 = vld [vmem:[%s1670_s15 + $0xd0] sm:$0xf] }
  0x43   : > { %706 = vmatpush.bf16.msra.mxu1 %v1291_v15  ;;  %1315 = vmatpush.bf16.msra.mxu3 %v1291_v15  ;;  %v1278_v15 = vld [vmem:[%s1670_s15 + $0xd4] sm:$0xf0] }
  0x44   : > { %v1159_v21 = vor.u32 %v1278_v15, %v1158_v14 }
  0x45   : > { %618 = vmatmul.bf16.vlgmr.msra.gmra.mxu0 %v1055_v24  ;;  %658 = vmatmul.bf16.vlgmr.msra.gmra.mxu2 %v1119_v25  ;;  %v1102_v24 = vld [vmem:[%s1670_s15 + $0x60] sm:$0xf]  ;;  %v1264_v25 = vld [vmem:[%s1670_s15 + $0x64] sm:$0xf0] }
  0x46   : > { %707 = vmatmul.bf16.vlgmr.msra.gmra.mxu1 %v1059_v26  ;;  %747 = vmatmul.bf16.vlgmr.msra.gmra.mxu3 %v1123_v27  ;;  %v1166_v26 = vld [vmem:[%s1670_s15 + $0xe0] sm:$0xf]  ;;  %v1280_v27 = vld [vmem:[%s1670_s15 + $0xe4] sm:$0xf0]  ;;  %v1103_v32 = vor.u32 %v1264_v25, %v1102_v24 }
  0x47   : > { %v1167_v33 = vor.u32 %v1280_v27, %v1166_v26 }
  0x55   : > { %623 = vmatmul.bf16.gmra.mxu0 %v1063_v36  ;;  %663 = vmatmul.bf16.gmra.mxu2 %v1127_v37  ;;  %v1110_v36 = vld [vmem:[%s1670_s15 + $0x70] sm:$0xf]  ;;  %v1266_v37 = vld [vmem:[%s1670_s15 + $0x74] sm:$0xf0] }
  0x56   : > { %712 = vmatmul.bf16.gmra.mxu1 %v1067_v38  ;;  %752 = vmatmul.bf16.gmra.mxu3 %v1131_v39  ;;  %v1174_v38 = vld [vmem:[%s1670_s15 + $0xf0] sm:$0xf]  ;;  %v1282_v39 = vld [vmem:[%s1670_s15 + $0xf4] sm:$0xf0]  ;;  %v1111_v44 = vor.u32 %v1266_v37, %v1110_v36 }
  0x57   : > { %v1175_v45 = vor.u32 %v1282_v39, %v1174_v38 }
  0x65   : > { %628 = vmatmul.bf16.gmra.mxu0 %v1071_v48  ;;  %668 = vmatmul.bf16.gmra.mxu2 %v1135_v49 }
  0x66   : > { %717 = vmatmul.bf16.gmra.mxu1 %v1075_v50  ;;  %757 = vmatmul.bf16.gmra.mxu3 %v1139_v51 }
  0x75   : > { %633 = vmatmul.bf16.gmra.mxu0 %v1079_v60  ;;  %673 = vmatmul.bf16.gmra.mxu2 %v1143_v61 }
  0x76   : > { %722 = vmatmul.bf16.gmra.mxu1 %v1083_v62  ;;  %762 = vmatmul.bf16.gmra.mxu3 %v1147_v63 }
  0x85   : > { %638 = vmatmul.bf16.gmra.mxu0 %v1087_v8  ;;  %678 = vmatmul.bf16.gmra.mxu2 %v1151_v9 }
  0x86   : > { %727 = vmatmul.bf16.gmra.mxu1 %v1091_v10  ;;  %767 = vmatmul.bf16.gmra.mxu3 %v1155_v11 }
  0x95   : > { %643 = vmatmul.bf16.gmra.mxu0 %v1095_v20  ;;  %683 = vmatmul.bf16.gmra.mxu2 %v1159_v21 }
  0x96   : > { %732 = vmatmul.bf16.gmra.mxu1 %v1099_v22  ;;  %772 = vmatmul.bf16.gmra.mxu3 %v1163_v23 }
  0xa5   : > { %648 = vmatmul.bf16.gmra.mxu0 %v1103_v32  ;;  %688 = vmatmul.bf16.gmra.mxu2 %v1167_v33 }
  0xa6   : > { %737 = vmatmul.bf16.gmra.mxu1 %v1107_v34  ;;  %777 = vmatmul.bf16.gmra.mxu3 %v1171_v35 }
  0xb5   : > { %653 = vmatmul.bf16.gmra.mxu0 %v1111_v44  ;;  %693 = vmatmul.bf16.gmra.mxu2 %v1175_v45 }
  0xb6   : > { %742 = vmatmul.bf16.gmra.mxu1 %v1115_v46  ;;  %782 = vmatmul.bf16.gmra.mxu3 %v1179_v47 }
  0xc2   : > { %v619_v48 = vpop.f32.mrf.mxu0 }
  0xc3   : > { %v708_v49 = vpop.f32.mrf.mxu1 }
  0xc4   : > { %v709_v50 = vadd.f32 %v708_v49, %v619_v48 }
  0xc6   : > { %887 = vst [vmem:[%s1746_s17] sm:$0xff] %v709_v50 }
  0xc8   : > { %v659_v51 = vpop.f32.mrf.mxu2 }
  0xc9   : > { %v748_v52 = vpop.f32.mrf.mxu3 }
  0xca   : > { %v749_v53 = vadd.f32 %v748_v52, %v659_v51  ;;  %v621_v54 = vpop.f32.mrf.mxu0 }
  0xcb   : > { %v710_v55 = vpop.f32.mrf.mxu1 }
  0xcc   : > { %903 = vst [vmem:[%s1746_s17 + $0x80] sm:$0xff] %v749_v53  ;;  %v711_v56 = vadd.f32 %v710_v55, %v621_v54 }
  0xce   : > { %888 = vst [vmem:[%s1746_s17 + $0x8] sm:$0xff] %v711_v56 }
  0xd0   : > { %v661_v57 = vpop.f32.mrf.mxu2 }
  0xd1   : > { %v750_v58 = vpop.f32.mrf.mxu3 }
  0xd2   : > { %v751_v59 = vadd.f32 %v750_v58, %v661_v57  ;;  %v624_v60 = vpop.f32.mrf.mxu0 }
  0xd3   : > { %v713_v61 = vpop.f32.mrf.mxu1 }
  0xd4   : > { %904 = vst [vmem:[%s1746_s17 + $0x88] sm:$0xff] %v751_v59  ;;  %v714_v62 = vadd.f32 %v713_v61, %v624_v60 }
  0xd6   : > { %889 = vst [vmem:[%s1746_s17 + $0x10] sm:$0xff] %v714_v62 }
  0xd8   : > { %v664_v63 = vpop.f32.mrf.mxu2 }
  0xd9   : > { %v753_v0 = vpop.f32.mrf.mxu3 }
  0xda   : > { %v754_v1 = vadd.f32 %v753_v0, %v664_v63  ;;  %v626_v2 = vpop.f32.mrf.mxu0 }
  0xdb   : > { %v715_v3 = vpop.f32.mrf.mxu1 }
  0xdc   : > { %905 = vst [vmem:[%s1746_s17 + $0x90] sm:$0xff] %v754_v1  ;;  %v716_v4 = vadd.f32 %v715_v3, %v626_v2 }
  0xde   : > { %890 = vst [vmem:[%s1746_s17 + $0x18] sm:$0xff] %v716_v4 }
  0xe0   : > { %v666_v5 = vpop.f32.mrf.mxu2 }
  0xe1   : > { %v755_v6 = vpop.f32.mrf.mxu3 }
  0xe2   : > { %v756_v7 = vadd.f32 %v755_v6, %v666_v5  ;;  %v629_v8 = vpop.f32.mrf.mxu0 }
  0xe3   : > { %v718_v9 = vpop.f32.mrf.mxu1 }
  0xe4   : > { %906 = vst [vmem:[%s1746_s17 + $0x98] sm:$0xff] %v756_v7  ;;  %v719_v10 = vadd.f32 %v718_v9, %v629_v8 }
  0xe6   : > { %891 = vst [vmem:[%s1746_s17 + $0x20] sm:$0xff] %v719_v10 }
  0xe8   : > { %v669_v11 = vpop.f32.mrf.mxu2 }
  0xe9   : > { %v758_v12 = vpop.f32.mrf.mxu3 }
  0xea   : > { %v759_v13 = vadd.f32 %v758_v12, %v669_v11  ;;  %v631_v14 = vpop.f32.mrf.mxu0 }
  0xeb   : > { %v720_v15 = vpop.f32.mrf.mxu1 }
  0xec   : > { %907 = vst [vmem:[%s1746_s17 + $0xa0] sm:$0xff] %v759_v13  ;;  %v721_v16 = vadd.f32 %v720_v15, %v631_v14 }
  0xee   : > { %892 = vst [vmem:[%s1746_s17 + $0x28] sm:$0xff] %v721_v16 }
  0xf0   : > { %v671_v17 = vpop.f32.mrf.mxu2 }
  0xf1   : > { %v760_v18 = vpop.f32.mrf.mxu3 }
  0xf2   : > { %v761_v19 = vadd.f32 %v760_v18, %v671_v17  ;;  %v634_v20 = vpop.f32.mrf.mxu0 }
  0xf3   : > { %v723_v21 = vpop.f32.mrf.mxu1 }
  0xf4   : > { %908 = vst [vmem:[%s1746_s17 + $0xa8] sm:$0xff] %v761_v19  ;;  %v724_v22 = vadd.f32 %v723_v21, %v634_v20 }
  0xf6   : > { %893 = vst [vmem:[%s1746_s17 + $0x30] sm:$0xff] %v724_v22 }
  0xf8   : > { %v674_v23 = vpop.f32.mrf.mxu2 }
  0xf9   : > { %v763_v24 = vpop.f32.mrf.mxu3 }
  0xfa   : > { %v764_v25 = vadd.f32 %v763_v24, %v674_v23  ;;  %v636_v26 = vpop.f32.mrf.mxu0 }
  0xfb   : > { %v725_v27 = vpop.f32.mrf.mxu1 }
  0xfc   : > { %909 = vst [vmem:[%s1746_s17 + $0xb0] sm:$0xff] %v764_v25  ;;  %v726_v28 = vadd.f32 %v725_v27, %v636_v26 }
  0xfe   : > { %894 = vst [vmem:[%s1746_s17 + $0x38] sm:$0xff] %v726_v28 }
 0x100   : > { %v676_v29 = vpop.f32.mrf.mxu2 }
 0x101   : > { %v765_v30 = vpop.f32.mrf.mxu3 }
 0x102   : > { %v766_v31 = vadd.f32 %v765_v30, %v676_v29  ;;  %v639_v32 = vpop.f32.mrf.mxu0 }
 0x103   : > { %v728_v33 = vpop.f32.mrf.mxu1 }
 0x104   : > { %910 = vst [vmem:[%s1746_s17 + $0xb8] sm:$0xff] %v766_v31  ;;  %v729_v34 = vadd.f32 %v728_v33, %v639_v32 }
 0x106   : > { %895 = vst [vmem:[%s1746_s17 + $0x40] sm:$0xff] %v729_v34 }
 0x108   : > { %v679_v35 = vpop.f32.mrf.mxu2 }
 0x109   : > { %v768_v36 = vpop.f32.mrf.mxu3 }
 0x10a   : > { %v769_v37 = vadd.f32 %v768_v36, %v679_v35  ;;  %v641_v38 = vpop.f32.mrf.mxu0 }
 0x10b   : > { %v730_v39 = vpop.f32.mrf.mxu1 }
 0x10c   : > { %911 = vst [vmem:[%s1746_s17 + $0xc0] sm:$0xff] %v769_v37  ;;  %v731_v40 = vadd.f32 %v730_v39, %v641_v38 }
 0x10e   : > { %896 = vst [vmem:[%s1746_s17 + $0x48] sm:$0xff] %v731_v40 }
 0x110   : > { %v681_v41 = vpop.f32.mrf.mxu2 }
 0x111   : > { %v770_v42 = vpop.f32.mrf.mxu3 }
 0x112   : > { %v771_v43 = vadd.f32 %v770_v42, %v681_v41  ;;  %v644_v44 = vpop.f32.mrf.mxu0 }
 0x113   : > { %v733_v45 = vpop.f32.mrf.mxu1 }
 0x114   : > { %912 = vst [vmem:[%s1746_s17 + $0xc8] sm:$0xff] %v771_v43  ;;  %v734_v46 = vadd.f32 %v733_v45, %v644_v44 }
 0x116   : > { %897 = vst [vmem:[%s1746_s17 + $0x50] sm:$0xff] %v734_v46 }
 0x118   : > { %v684_v47 = vpop.f32.mrf.mxu2 }
 0x119   : > { %v773_v48 = vpop.f32.mrf.mxu3 }
 0x11a   : > { %v774_v49 = vadd.f32 %v773_v48, %v684_v47  ;;  %v646_v50 = vpop.f32.mrf.mxu0 }
 0x11b   : > { %v735_v51 = vpop.f32.mrf.mxu1 }
 0x11c   : > { %913 = vst [vmem:[%s1746_s17 + $0xd0] sm:$0xff] %v774_v49  ;;  %v736_v52 = vadd.f32 %v735_v51, %v646_v50 }
 0x11e   : > { %898 = vst [vmem:[%s1746_s17 + $0x58] sm:$0xff] %v736_v52 }
 0x120   : > { %v686_v53 = vpop.f32.mrf.mxu2 }
 0x121   : > { %v775_v54 = vpop.f32.mrf.mxu3 }
 0x122   : > { %v776_v55 = vadd.f32 %v775_v54, %v686_v53  ;;  %v649_v56 = vpop.f32.mrf.mxu0 }
 0x123   : > { %v738_v57 = vpop.f32.mrf.mxu1 }
 0x124   : > { %914 = vst [vmem:[%s1746_s17 + $0xd8] sm:$0xff] %v776_v55  ;;  %v739_v58 = vadd.f32 %v738_v57, %v649_v56 }
 0x126   : > { %899 = vst [vmem:[%s1746_s17 + $0x60] sm:$0xff] %v739_v58 }
 0x128   : > { %v689_v59 = vpop.f32.mrf.mxu2 }
 0x129   : > { %v778_v60 = vpop.f32.mrf.mxu3 }
 0x12a   : > { %v779_v61 = vadd.f32 %v778_v60, %v689_v59  ;;  %v651_v62 = vpop.f32.mrf.mxu0 }
 0x12b   : > { %v740_v63 = vpop.f32.mrf.mxu1 }
 0x12c   : > { %915 = vst [vmem:[%s1746_s17 + $0xe0] sm:$0xff] %v779_v61  ;;  %v741_v0 = vadd.f32 %v740_v63, %v651_v62 }
 0x12e   : > { %900 = vst [vmem:[%s1746_s17 + $0x68] sm:$0xff] %v741_v0 }
 0x130   : > { %v691_v1 = vpop.f32.mrf.mxu2 }
 0x131   : > { %v780_v2 = vpop.f32.mrf.mxu3 }
 0x132   : > { %v781_v3 = vadd.f32 %v780_v2, %v691_v1  ;;  %v654_v4 = vpop.f32.mrf.mxu0 }
 0x133   : > { %v743_v5 = vpop.f32.mrf.mxu1 }
 0x134   : > { %916 = vst [vmem:[%s1746_s17 + $0xe8] sm:$0xff] %v781_v3  ;;  %v744_v6 = vadd.f32 %v743_v5, %v654_v4 }
 0x136   : > { %901 = vst [vmem:[%s1746_s17 + $0x70] sm:$0xff] %v744_v6 }
 0x138   : > { %v694_v7 = vpop.f32.mrf.mxu2 }
 0x139   : > { %v783_v8 = vpop.f32.mrf.mxu3 }
 0x13a   : > { %v784_v9 = vadd.f32 %v783_v8, %v694_v7  ;;  %v656_v10 = vpop.f32.mrf.mxu0 }
 0x13b   : > { %v745_v11 = vpop.f32.mrf.mxu1 }
 0x13c   : > { %917 = vst [vmem:[%s1746_s17 + $0xf0] sm:$0xff] %v784_v9  ;;  %v746_v12 = vadd.f32 %v745_v11, %v656_v10 }
 0x13e   : > { %902 = vst [vmem:[%s1746_s17 + $0x78] sm:$0xff] %v746_v12 }
 0x140   : > { %v696_v13 = vpop.f32.mrf.mxu2 }
 0x141   : > { %v785_v14 = vpop.f32.mrf.mxu3 }
 0x142   : > { %v786_v15 = vadd.f32 %v785_v14, %v696_v13 }
 0x144   : > { %918 = vst [vmem:[%s1746_s17 + $0xf8] sm:$0xff] %v786_v15 }
 0x145   : > { %1482 = shalt.err (!%p1479_p0)
}
 0x146   : > { %s1548_s30 = smov 128   ;;  %s1549_s5 = smov 8  }
 0x147   : > { %1322 = dma.vmem_to_hbm [thread:$0]  (%p1644_p5), %s934_s16, 4096, %s936_s21, %s920_s12, %s1548_s30, %s1548_s30, %s1549_s5  }
 0x148 PF: > { %s950_s7 = sand.u32 1, %s1521_s9   ;;  %p1333_p3 = pnand %p1043_p11, %p1614_p6 }
 0x149   : > { %s951_s15 = scalar_lea.sflag [#allocation5], %s950_s7 }
 0x14a   : > { %p1334_p7 = pneg %p1333_p3 }
 0x14c   : > { %1516 = dma.done.wait (%p1334_p7), %s951_s15, 4096  }
 0x14d   : > { %1518 = vsyncadd (%p1334_p7), %s951_s15, 4294963200  ;;  %s19_s14 = sadd.s32 1, %s1541_s14   ;;  %s1829_s9 = smov %s1525_s10 }
 0x14e   : > { %p16_p9 = scmp.ge.s32.totalorder %s19_s14, 4   ;;  %s1830_s10 = smov %s1529_s11 }
 0x14f   : > { %s1831_s11 = smov %s1653_s8  ;;  %s1832_s12 = smov %s1537_s13 }
 0x150   : > { %s1833_s13 = smov %s1835_s29  ;;  %18 = sbr.rel (!%p16_p9) target bundleno = 7 (0x7), region = 86 }
 0x155   :  { %957 = vsyncpa [#allocation4], 1 }
 0x156   :  { %959 = vsyncpa [#allocation4 + $0x1], 1 }
 0x157   :  { %960 = vsyncpa [#allocation7], 1 }
 0x158   :  { %961 = vsyncpa [#allocation5], 1 }
 0x159   :  { %963 = vsyncpa [#allocation5 + $0x1], 1 }

</bundles_post_ra>
